<compile_context>
chip_gen: v5e
topology: v5e:2x2
jax: 0.10.0
libtpu: 0.0.40
codegen_flags: <defaults>
</compile_context>

<pallas_src>
import jax
import jax.numpy as jnp
from jax.experimental import pallas as pl
from jax.experimental.pallas import tpu as pltpu

_COMPUTE_DTYPE = jnp.bfloat16


# ----------------------------------------------------------------------------
# Shared epilogue: folded BatchNorm + ReLU + optional fused 2x2 max pool
# ----------------------------------------------------------------------------
def _bn_relu_maybe_pool(acc, scale, bias, nb, h, w, cout, pool):
    """acc: (nb*h*w, cout) f32, rows ordered (n, h, w) -> (nb, Ho, Wo, cout)."""
    y = jnp.maximum(acc * scale + bias, 0.0)              # BN (eval) + ReLU, f32
    if pool:
        ho, wo = h // 2, w // 2
        # 2x2 / stride-2 max pool on the flattened-row layout (lane dim = C).
        y = y.reshape(nb * h * wo, 2, cout)
        y = jnp.maximum(y[:, 0, :], y[:, 1, :])            # max over W pairs
        y = y.reshape(nb * ho, 2, wo, cout)
        y = jnp.maximum(y[:, 0, :, :], y[:, 1, :, :])      # max over H pairs
        return y.reshape(nb, ho, wo, cout)
    return y.reshape(nb, h, w, cout)


# ----------------------------------------------------------------------------
# Conv3x3(pad=1) + BN + ReLU (+ optional fused MaxPool2x2) kernel
# ----------------------------------------------------------------------------
def _make_conv3x3_kernel(pool):
    def kernel(x_ref, w_ref, s_ref, b_ref, o_ref, xp_ref):
        # x_ref : (nb, H, W, Cin)        bf16 input block
        # w_ref : (9, Cin, Cout)         bf16 taps, row order (dy, dx)
        # s_ref : (1, Cout) f32          folded BN scale = gamma/sqrt(var+eps)
        # b_ref : (1, Cout) f32          folded BN bias  = beta + (cb-mean)*scale
        # o_ref : (nb, Ho, Wo, Cout)     bf16
        # xp_ref: (nb, H+2, W+2, Cin)    VMEM scratch holding the padded tile
        nb, h, w, cin = x_ref.shape
        cout = o_ref.shape[-1]
        dt = xp_ref.dtype

        # Build the zero halo in VMEM (border slabs only; interior overwritten).
        xp_ref[:, 0:1, :, :] = jnp.zeros((nb, 1, w + 2, cin), dt)
        xp_ref[:, h + 1:h + 2, :, :] = jnp.zeros((nb, 1, w + 2, cin), dt)
        xp_ref[:, 1:h + 1, 0:1, :] = jnp.zeros((nb, h, 1, cin), dt)
        xp_ref[:, 1:h + 1, w + 1:w + 2, :] = jnp.zeros((nb, h, 1, cin), dt)
        xp_ref[:, 1:h + 1, 1:w + 1, :] = x_ref[...]

        m = nb * h * w
        acc = jnp.zeros((m, cout), jnp.float32)
        for dy in range(3):
            for dx in range(3):
                patch = xp_ref[:, dy:dy + h, dx:dx + w, :].reshape(m, cin)
                acc = acc + jnp.dot(patch, w_ref[dy * 3 + dx],
                                    preferred_element_type=jnp.float32)

        y = _bn_relu_maybe_pool(acc, s_ref[0], b_ref[0], nb, h, w, cout, pool)
        o_ref[...] = y.astype(o_ref.dtype)

    return kernel


# ----------------------------------------------------------------------------
# 1x1-conv (pre-im2col'ed layer 1) + BN + ReLU (+ optional pool) kernel
# ----------------------------------------------------------------------------
def _make_conv1x1_kernel(pool):
    def kernel(x_ref, w_ref, s_ref, b_ref, o_ref):
        # x_ref: (nb, H, W, K)  bf16 (K = 9*Cin patch rows, K=27 for RGB)
        # w_ref: (K, Cout)      bf16
        nb, h, w, k = x_ref.shape
        cout = o_ref.shape[-1]
        m = nb * h * w
        x2 = x_ref[...].reshape(m, k)
        acc = jnp.dot(x2, w_ref[...], preferred_element_type=jnp.float32)
        y = _bn_relu_maybe_pool(acc, s_ref[0], b_ref[0], nb, h, w, cout, pool)
        o_ref[...] = y.astype(o_ref.dtype)

    return kernel


# ----------------------------------------------------------------------------
# Wrappers
# ----------------------------------------------------------------------------
def _pick_batch_block(n, hw, target_m=128):
    """Smallest divisor nb of n with nb*hw >= target_m (else n): MXU M-occupancy."""
    best = 1
    for nb in range(1, n + 1):
        if n % nb == 0:
            best = nb
            if nb * hw >= target_m:
                break
    return best


def conv3x3_bn_relu(x, w, scale, bias, *, pool):
    """x: (N,H,W,Cin); w: (3,3,Cin,Cout); scale/bias: (Cout,) -> (N,Ho,Wo,Cout) bf16."""
    n, h, w_sp, cin = x.shape
    cout = w.shape[-1]
    if pool:
        assert h % 2 == 0 and w_sp % 2 == 0, "MaxPool2d(2,2) needs even H, W"
    ho, wo = (h // 2, w_sp // 2) if pool else (h, w_sp)
    nb = _pick_batch_block(n, h * w_sp)

    w9 = w.reshape(9, cin, cout).astype(_COMPUTE_DTYPE)
    s = scale.reshape(1, cout).astype(jnp.float32)
    b = bias.reshape(1, cout).astype(jnp.float32)

    return pl.pallas_call(
        _make_conv3x3_kernel(pool),
        out_shape=jax.ShapeDtypeStruct((n, ho, wo, cout), _COMPUTE_DTYPE),
        grid_spec=pltpu.PrefetchScalarGridSpec(
            num_scalar_prefetch=0,
            grid=(n // nb,),
            in_specs=[
                pl.BlockSpec((nb, h, w_sp, cin), lambda i: (i, 0, 0, 0)),
                pl.BlockSpec((9, cin, cout), lambda i: (0, 0, 0)),
                pl.BlockSpec((1, cout), lambda i: (0, 0)),
                pl.BlockSpec((1, cout), lambda i: (0, 0)),
            ],
            out_specs=pl.BlockSpec((nb, ho, wo, cout), lambda i: (i, 0, 0, 0)),
            scratch_shapes=[pltpu.VMEM((nb, h + 2, w_sp + 2, cin), _COMPUTE_DTYPE)],
        ),
        compiler_params=pltpu.CompilerParams(dimension_semantics=("parallel",)),
    )(x.astype(_COMPUTE_DTYPE), w9, s, b)


def conv1x1_bn_relu(x, w2, scale, bias, *, pool):
    """x: (N,H,W,K) patch rows; w2: (K,Cout); scale/bias: (Cout,)."""
    n, h, w_sp, k = x.shape
    cout = w2.shape[-1]
    if pool:
        assert h % 2 == 0 and w_sp % 2 == 0
    ho, wo = (h // 2, w_sp // 2) if pool else (h, w_sp)
    nb = _pick_batch_block(n, h * w_sp)

    s = scale.reshape(1, cout).astype(jnp.float32)
    b = bias.reshape(1, cout).astype(jnp.float32)

    return pl.pallas_call(
        _make_conv1x1_kernel(pool),
        out_shape=jax.ShapeDtypeStruct((n, ho, wo, cout), _COMPUTE_DTYPE),
        grid_spec=pltpu.PrefetchScalarGridSpec(
            num_scalar_prefetch=0,
            grid=(n // nb,),
            in_specs=[
                pl.BlockSpec((nb, h, w_sp, k), lambda i: (i, 0, 0, 0)),
                pl.BlockSpec((k, cout), lambda i: (0, 0)),
                pl.BlockSpec((1, cout), lambda i: (0, 0)),
                pl.BlockSpec((1, cout), lambda i: (0, 0)),
            ],
            out_specs=pl.BlockSpec((nb, ho, wo, cout), lambda i: (i, 0, 0, 0)),
        ),
        compiler_params=pltpu.CompilerParams(dimension_semantics=("parallel",)),
    )(x.astype(_COMPUTE_DTYPE), w2.astype(_COMPUTE_DTYPE), s, b)


def _im2col_3x3(x):
    """(N,H,W,C) -> (N,H,W,9*C) zero-padded 3x3 patches, tap order (dy, dx, c).

    Only used for the 3-channel first layer (tiny tensor), so the K=27 matmul
    replaces nine K=3 matmuls on the MXU.
    """
    n, h, w, c = x.shape
    xp = jnp.pad(x, ((0, 0), (1, 1), (1, 1), (0, 0)))
    taps = [xp[:, dy:dy + h, dx:dx + w, :] for dy in range(3) for dx in range(3)]
    return jnp.concatenate(taps, axis=-1)


# ----------------------------------------------------------------------------
# Parameter construction (deterministic, synthetic) and forward
# ----------------------------------------------------------------------------
def make_vgg_stem_params(d_model, key):
    cfg = [64, 64, 'M', 128, 128, 'M', d_model, 'M']
    params = []
    in_c = 3
    eps = 1e-5
    for item in cfg:
        if item == 'M':
            params.append('M')
            continue
        out_c = item
        key, k1, k2, k3, k4, k5, k6 = jax.random.split(key, 7)
        fan_in = in_c * 9
        w = jax.random.normal(k1, (3, 3, in_c, out_c), jnp.float32) / jnp.sqrt(fan_in)
        conv_b = 0.01 * jax.random.normal(k2, (out_c,), jnp.float32)
        gamma = 1.0 + 0.1 * jax.random.normal(k3, (out_c,), jnp.float32)
        beta = 0.1 * jax.random.normal(k4, (out_c,), jnp.float32)
        r_mean = 0.1 * jax.random.normal(k5, (out_c,), jnp.float32)
        r_var = 1.0 + 0.1 * jnp.abs(jax.random.normal(k6, (out_c,), jnp.float32))
        # Fold conv-bias + BatchNorm(eval) into per-channel scale / bias.
        scale = gamma / jnp.sqrt(r_var + eps)
        bias = beta + (conv_b - r_mean) * scale
        params.append((w, scale, bias))
        in_c = out_c
    return params


def _build_stages(params):
    """Pair every conv with a flag: is it immediately followed by 'M'?"""
    stages = []
    i = 0
    while i < len(params):
        p = params[i]
        assert not isinstance(p, str)
        pool = (i + 1 < len(params) and isinstance(params[i + 1], str))
        stages.append((p[0], p[1], p[2], pool))
        i += 2 if pool else 1
    return stages


def vgg_stem_forward(x_nchw, params):
    stages = _build_stages(params)
    x = jnp.transpose(x_nchw, (0, 2, 3, 1))                 # NCHW -> NHWC
    for idx, (w, scale, bias, pool) in enumerate(stages):
        cin = w.shape[2]
        if idx == 0 and cin <= 4:
            # First layer: fold the 3x3 taps into the contraction (K = 9*Cin).
            patches = _im2col_3x3(x)
            x = conv1x1_bn_relu(patches, w.reshape(9 * cin, -1), scale, bias,
                                pool=pool)
        else:
            x = conv3x3_bn_relu(x, w, scale, bias, pool=pool)
    return jnp.transpose(x.astype(jnp.float32), (0, 3, 1, 2))  # back to NCHW


if __name__ == "__main__":
    d_model = 128
    key = jax.random.PRNGKey(0)
    key_x, key_p = jax.random.split(key)

    # small deterministic input: batch=2, channels=3 (RGB), spatial=16x16 (NCHW)
    x = jax.random.normal(key_x, (2, 3, 16, 16), jnp.float32)
    params = make_vgg_stem_params(d_model, key_p)

    out = vgg_stem_forward(x, params)
    out = jax.block_until_ready(out)

    assert out.shape == (2, d_model, 2, 2), out.shape
    assert out.dtype == jnp.float32
    assert bool(jnp.all(jnp.isfinite(out)))
    assert bool(jnp.all(out >= 0.0))     # ReLU (then max-pool) output is non-negative

    print("KERNEL_OK")
</pallas_src>

<mosaic_0001>
module attributes {stable_mosaic.version = 11 : i64} {
  func.func @kernel(%arg0: i32, %arg1: memref<1x16x16x27xbf16, #tpu.memory_space<vmem>>, %arg2: memref<27x64xbf16, #tpu.memory_space<vmem>>, %arg3: memref<1x64xf32, #tpu.memory_space<vmem>>, %arg4: memref<1x64xf32, #tpu.memory_space<vmem>>, %arg5: memref<1x16x16x64xbf16, #tpu.memory_space<vmem>>) attributes {dimension_semantics = [#tpu.dimension_semantics<parallel>], iteration_bounds = array<i64: 2>, scalar_prefetch = 0 : i64, scratch_operands = 0 : i64, tpu.core_type = #tpu.core_type<tc>, window_params = [{transform_indices = @transform_0, window_bounds = array<i64: 1, 16, 16, 27>}, {pipeline_mode = #tpu.pipeline_mode<synchronous>, transform_indices = @transform_1, window_bounds = array<i64: 27, 64>}, {pipeline_mode = #tpu.pipeline_mode<synchronous>, transform_indices = @transform_2, window_bounds = array<i64: 1, 64>}, {pipeline_mode = #tpu.pipeline_mode<synchronous>, transform_indices = @transform_3, window_bounds = array<i64: 1, 64>}, {transform_indices = @transform_4, window_bounds = array<i64: 1, 16, 16, 64>}]} {
    %c0 = arith.constant 0 : index
    %c0_0 = arith.constant 0 : index
    %c0_1 = arith.constant 0 : index
    %c0_2 = arith.constant 0 : index
    %0 = vector.load %arg1[%c0, %c0_0, %c0_1, %c0_2] : memref<1x16x16x27xbf16, #tpu.memory_space<vmem>>, vector<1x16x16x27xbf16>
    %1 = vector.shape_cast %0 : vector<1x16x16x27xbf16> to vector<256x27xbf16>
    %c0_3 = arith.constant 0 : index
    %c0_4 = arith.constant 0 : index
    %2 = vector.load %arg2[%c0_3, %c0_4] : memref<27x64xbf16, #tpu.memory_space<vmem>>, vector<27x64xbf16>
    %cst = arith.constant dense<0.000000e+00> : vector<256x64xf32>
    %3 = tpu.matmul %1, %2, %cst {dimension_numbers = #tpu.dot_dimension_numbers<[1], [0], [0], [1], [0, 0, 1, 1], [], []>} : vector<256x27xbf16>, vector<27x64xbf16>, vector<256x64xf32> -> vector<256x64xf32>
    %c0_5 = arith.constant 0 : index
    %c0_6 = arith.constant 0 : index
    %4 = vector.load %arg3[%c0_5, %c0_6] : memref<1x64xf32, #tpu.memory_space<vmem>>, vector<1x64xf32>
    %5 = vector.shape_cast %4 : vector<1x64xf32> to vector<64xf32>
    %c0_7 = arith.constant 0 : index
    %c0_8 = arith.constant 0 : index
    %6 = vector.load %arg4[%c0_7, %c0_8] : memref<1x64xf32, #tpu.memory_space<vmem>>, vector<1x64xf32>
    %7 = vector.shape_cast %6 : vector<1x64xf32> to vector<64xf32>
    %8 = vector.shape_cast %5 : vector<64xf32> to vector<1x64xf32>
    %9 = vector.broadcast %8 : vector<1x64xf32> to vector<256x64xf32>
    %10 = arith.mulf %3, %9 : vector<256x64xf32>
    %11 = vector.shape_cast %7 : vector<64xf32> to vector<1x64xf32>
    %12 = vector.broadcast %11 : vector<1x64xf32> to vector<256x64xf32>
    %13 = arith.addf %10, %12 : vector<256x64xf32>
    %cst_9 = arith.constant 0.000000e+00 : f32
    %14 = vector.broadcast %cst_9 : f32 to vector<256x64xf32>
    %15 = arith.maximumf %13, %14 : vector<256x64xf32>
    %16 = vector.shape_cast %15 : vector<256x64xf32> to vector<1x16x16x64xf32>
    %17 = arith.truncf %16 : vector<1x16x16x64xf32> to vector<1x16x16x64xbf16>
    %c0_10 = arith.constant 0 : index
    %c0_11 = arith.constant 0 : index
    %c0_12 = arith.constant 0 : index
    %c0_13 = arith.constant 0 : index
    %18 = vector.load %arg5[%c0_10, %c0_11, %c0_12, %c0_13] : memref<1x16x16x64xbf16, #tpu.memory_space<vmem>>, vector<1x16x16x64xbf16>
    tpu.vector_store %arg5[%c0_10, %c0_11, %c0_12, %c0_13], %17 {strides = array<i32>} : memref<1x16x16x64xbf16, #tpu.memory_space<vmem>>, vector<1x16x16x64xbf16>,
    return
  }
  func.func @transform_0(%arg0: i32) -> (i32, i32, i32, i32) {
    %c0_i32 = arith.constant 0 : i32
    %c0_i32_0 = arith.constant 0 : i32
    %c0_i32_1 = arith.constant 0 : i32
    %c0_i32_2 = arith.constant 0 : i32
    return %arg0, %c0_i32, %c0_i32_0, %c0_i32_1 : i32, i32, i32, i32
  }
  func.func @transform_1(%arg0: i32) -> (i32, i32) {
    %c0_i32 = arith.constant 0 : i32
    %c0_i32_0 = arith.constant 0 : i32
    %c0_i32_1 = arith.constant 0 : i32
    return %c0_i32, %c0_i32_0 : i32, i32
  }
  func.func @transform_2(%arg0: i32) -> (i32, i32) {
    %c0_i32 = arith.constant 0 : i32
    %c0_i32_0 = arith.constant 0 : i32
    %c0_i32_1 = arith.constant 0 : i32
    return %c0_i32, %c0_i32_0 : i32, i32
  }
  func.func @transform_3(%arg0: i32) -> (i32, i32) {
    %c0_i32 = arith.constant 0 : i32
    %c0_i32_0 = arith.constant 0 : i32
    %c0_i32_1 = arith.constant 0 : i32
    return %c0_i32, %c0_i32_0 : i32, i32
  }
  func.func @transform_4(%arg0: i32) -> (i32, i32, i32, i32) {
    %c0_i32 = arith.constant 0 : i32
    %c0_i32_0 = arith.constant 0 : i32
    %c0_i32_1 = arith.constant 0 : i32
    %c0_i32_2 = arith.constant 0 : i32
    return %arg0, %c0_i32, %c0_i32_0, %c0_i32_1 : i32, i32, i32, i32
  }
}

</mosaic_0001>

<bundles_post_ra>
// kernel: tpu_custom_call.1
= control target key start
LH: loop header
LB: loop body
LE: loop exit
PB: predicated region body
PF: predicated region fallthrough
CT: control target
= control target key end

     0   :  { %9 = vsyncpa [#allocation3], 0  ;;  %s1456_s0 = inlined_call_operand.hbm [shape: bf16[2,16,16,27], index: 0, kind: input, shape index: {}]   ;;  %s1457_s1 = inlined_call_operand.hbm [shape: bf16[27,64], index: 1, kind: input, shape index: {}]   ;;  %s1458_s2 = inlined_call_operand.vmem [shape: f32[1,64], index: 2, kind: input, shape index: {}]   ;;  %s1459_s3 = inlined_call_operand.vmem [shape: f32[1,64], index: 3, kind: input, shape index: {}]   ;;  %s1460_s4 = inlined_call_operand.hbm [shape: bf16[2,16,16,64], index: 4, kind: output, shape index: {}]  }
   0x1   :  { %11 = vsyncpa [#allocation3 + $0x1], 0 }
   0x2   :  { %12 = vsyncpa [#allocation6], 0 }
   0x3   :  { %13 = vsyncpa [#allocation4], 0 }
   0x4   :  { %15 = vsyncpa [#allocation4 + $0x1], 0  ;;  %s1133_s15 = smov 0   ;;  %s1135_s16 = smov 0  }
   0x5   :  { %s1137_s17 = smov 0   ;;  %s1139_s18 = smov 0  }
   0x6 LB: > { %s1154_s19 = sadd.s32 4294967295, %s1100_s18   ;;  %s776_s20 = sadd.s32 4294967294, %s1100_s18   ;;  %s1100_s18 = sphi %s1139_s18, %s1470_s18   ;;  %s1096_s17 = sphi %s1137_s17, %s1469_s17   ;;  %s1092_s16 = sphi %s1135_s16, %s1468_s16   ;;  %s1088_s15 = sphi %s1133_s15, %s1467_s15  }
   0x7   : > { %p41_p0 = scmp.ne.s32.totalorder %s1092_s16, %s1088_s15  ;;  %p42_p1 = scmp.eq.s32.totalorder %s1154_s19, 0 }
   0x8   : > { %p128_p2 = scmp.eq.s32.totalorder %s1154_s19, 1  ;;  %p134_p3 = scmp.eq.s32.totalorder %s776_s20, 1 }
   0x9   : > { %p1163_p4 = por %p42_p1, %p41_p0  ;;  %p777_p5 = scmp.ge.s32.totalorder %s1100_s18, 1 }
   0xa   : > { %p1168_p6 = por %p134_p3, %p41_p0  ;;  %p141_p7 = scmp.lt.s32.totalorder %s1100_s18, 3 }
   0xb   : > { %s152_s25 = sshll.u32 %s1457_s1, 4  ;;  %s1102_s27 = smov [#allocation5]   ;;  %s153_s25 = int_to_ptr.hbm [resolvable:$true] %s152_s25 }
   0xc   : > { %p1176_p8 = pnand %p777_p5, %p141_p7  ;;  %s154_s28 = sshll.u32 %s1102_s27, 4  ;;  %s155_s28 = int_to_ptr.vmem [resolvable:$true] %s154_s28 }
   0xd   : > { %s1186_s29 = sadd.s32 1, %s1100_s18   ;;  %s1103_s30 = smov 64  }
   0xe   : > { %p914_p9 = pneg %p1176_p8  ;;  %s1104_s5 = smov 4  }
   0xf   : > { %s25_s6 = ssub.s32 %s1100_s18, %s1186_s29  ;;  %s28_s7 = sadd.s32 1, %s1096_s17 }
  0x10   : > { %p915_p10 = pnand %p914_p9, %p42_p1  ;;  %p26_p12 = scmp.eq.s32.totalorder %s25_s6, 0 }
  0x11   : > { %p35_p13 = scmp.ne.s32.totalorder %s1096_s17, %s1092_s16  ;;  %p36_p0 = scmp.eq.s32.totalorder %s1100_s18, 0 }
  0x12   : > { %917 = dma.hbm_to_vmem [thread:$0]  (!%p915_p10), %s153_s25, 256, %s155_s28, [#allocation6], %s1103_s30, %s1103_s30, %s1104_s5  }
  0x13   : > { %s1198_s8 = scalar_select %p26_p12, %s1096_s17, %s28_s7  }
  0x14   : > { %p1202_p3 = por %p128_p2, %p35_p13  ;;  %p927_p5 = scmp.lt.s32.totalorder %s1100_s18, 2 }
  0x15   : > { %s174_s10 = sand.u32 1, %s1096_s17   ;;  %s880_s11 = sshll.u32 %s1100_s18, 7 }
  0x16   : > { %p37_p7 = por %p36_p0, %p35_p13  ;;  %s780_s12 = sshll.u32 %s174_s10, 7 }
  0x17   : > { %s183_s20 = scalar_lea.hbm %s1456_s0, %s880_s11  ;;  %s178_s24 = scalar_lea.vmem [#allocation2], %s780_s12 }
  0x18   : > { %s184_s23 = sshll.u32 %s183_s20, 4  ;;  %s186_s25 = sshll.u32 %s178_s24, 4  ;;  %s185_s23 = int_to_ptr.hbm [resolvable:$true] %s184_s23  ;;  %s187_s25 = int_to_ptr.vmem [resolvable:$true] %s186_s25 }
  0x19   : > { %p1212_p9 = pnand %p927_p5, %p37_p7  ;;  %s175_s28 = scalar_lea.sflag [#allocation3], %s174_s10 }
  0x1a   : > { %s1000_s6 = sshra.s32 %s185_s23, 4  ;;  %s1007_s12 = scalar_lea.hbm %s1456_s0, 256  ;;  %s1001_s6 = int_to_ptr.hbm [resolvable:$true] %s1000_s6 }
  0x1b   : > { %s1002_s7 = scalar_lea.hbm %s1001_s6, 128  ;;  %p1004_p10 = pneg %p1212_p9 }
  0x1c   : > { %p1003_p2 = scmp.ne.s32.totalorder %s1001_s6, %s1002_s7  ;;  %p1008_p0 = scmp.lt.s32.totalorder %s1001_s6, %s1456_s0 }
  0x1d   : > { %p1009_p5 = scmp.lt.s32.totalorder %s1007_s12, %s1002_s7 }
  0x1e   : > { %p1005_p12 = pnand %p1004_p10, %p1003_p2 }
  0x1f   : > { %p1010_p7 = por %p1009_p5, %p1008_p0 }
  0x20   : > { %p1006_p13 = pneg %p1005_p12 }
  0x22   : > { %p1011_p11 = pnand %p1010_p7, %p1006_p13 }
  0x24   : > { %1014 = shalt.err (!%p1011_p11)
}
  0x25   : > { %921 = dma.hbm_to_vmem [thread:$0]  (!%p1212_p9), %s185_s23, 2048, %s187_s25, %s175_s28, %s1103_s30, %s1103_s30, %s1104_s5  }
  0x26   : > { %198 = sbr.rel (%p1176_p8) target bundleno = 261 (0x105), region = 36  ;;  %s1232_s10 = sand.u32 (!%p1176_p8), 1, %s1092_s16  }
  0x27   : > { %s784_s24 = sshll.u32 (!%p1176_p8), %s1232_s10, 7  ;;  %s201_s6 = scalar_lea.sflag (!%p1176_p8), [#allocation3], %s1232_s10 }
  0x28   : > { %s1238_s7 = scalar_lea.vmem (!%p1176_p8), [#allocation2], %s784_s24 }
  0x2b   : > { %1075 = dma.done.wait (%p1163_p4), %s201_s6, 2048  }
  0x2c   : > { %1077 = vsyncadd (%p1163_p4), %s201_s6, 4294965248 }
  0x2d   : > { %1079 = dma.done.wait (%p42_p1), [#allocation6], 256  }
  0x2e   : > { %1081 = vsyncadd (%p42_p1), [#allocation6], 4294967040  ;;  %vm412_vm0 = vcmask 1044480   ;;  %vm413_vm1 = vcmask 1045504   ;;  %v1105_v0 = vmov 65535   ;;  %v897_v7 = vld [vmem:[#allocation5] sm:$0xff] }
  0x2f   : > { %v414_v1 = vsel %vm412_vm0, 4294967295, %v1105_v0  ;;  %v857_v2 = vld [vmem:[#allocation5 + $0x8] sm:$0xf]  ;;  %v898_v3 = vld [vmem:[#allocation5 + $0x8] sm:$0x30]  ;;  %v881_v8 = vld [vmem:[%s1238_s7] sm:$0xff] }
  0x30   : > { %v415_v4 = vsel %vm413_vm1, %v414_v1, 0  ;;  %v858_v5 = vor.u32 %v898_v3, %v857_v2  ;;  %v885_v9 = vld [vmem:[%s1238_s7 + $0x20] sm:$0xff]  ;;  %vm363_vm2 = vcmask 220160   ;;  %v882_v12 = vld [vmem:[%s1238_s7 + $0x8] sm:$0xff]  ;;  %v883_v16 = vld [vmem:[%s1238_s7 + $0x10] sm:$0xff]  ;;  %vm644_vm3 = vcmask 519168  }
  0x31   : > { %v889_v10 = vld [vmem:[%s1238_s7 + $0x40] sm:$0xff]  ;;  %v886_v13 = vld [vmem:[%s1238_s7 + $0x28] sm:$0xff]  ;;  %v887_v17 = vld [vmem:[%s1238_s7 + $0x30] sm:$0xff]  ;;  %s1298_s23 = scalar_lea.vmem [#allocation7], %s784_s24  ;;  %s899_s25 = sshll.u32 %s1154_s19, 7 }
  0x32   : > { %v417_v6 = vand.u32 %v858_v5, %v415_v4  ;;  %v893_v11 = vld [vmem:[%s1238_s7 + $0x60] sm:$0xff]  ;;  %v890_v14 = vld [vmem:[%s1238_s7 + $0x48] sm:$0xff]  ;;  %v891_v18 = vld [vmem:[%s1238_s7 + $0x50] sm:$0xff]  ;;  %s689_s11 = scalar_lea.hbm %s1460_s4, %s899_s25  ;;  %s690_s19 = sshll.u32 %s1298_s23, 4  ;;  %s691_s19 = int_to_ptr.vmem [resolvable:$true] %s690_s19 }
  0x33   : > { %v894_v15 = vld [vmem:[%s1238_s7 + $0x68] sm:$0xff]  ;;  %v895_v19 = vld [vmem:[%s1238_s7 + $0x70] sm:$0xff]  ;;  %v884_v20 = vld [vmem:[%s1238_s7 + $0x18] sm:$0xff]  ;;  %s692_s13 = sshll.u32 %s689_s11, 4  ;;  %s678_s12 = scalar_lea.sflag [#allocation4], %s1232_s10  ;;  %s693_s13 = int_to_ptr.hbm [resolvable:$true] %s692_s13 }
  0x34   : > { %425 = vmatpush.bf16.msra.mxu0 %v417_v6  ;;  %900 = vmatpush.bf16.msra.mxu1 %v417_v6  ;;  %v888_v21 = vld [vmem:[%s1238_s7 + $0x38] sm:$0xff]  ;;  %v1283_v24 = vld [vmem:[%s1458_s2] ss:$0 sm:$0xff]  ;;  %s1044_s14 = sshra.s32 %s693_s13, 4  ;;  %s1045_s14 = int_to_ptr.hbm [resolvable:$true] %s1044_s14 }
  0x35   : > { %901 = vmatpush.bf16.msra.mxu2 %v417_v6  ;;  %902 = vmatpush.bf16.msra.mxu3 %v417_v6  ;;  %v892_v22 = vld [vmem:[%s1238_s7 + $0x58] sm:$0xff]  ;;  %v1288_v25 = vld [vmem:[%s1459_s3] ss:$0 sm:$0xff]  ;;  %s1046_s20 = scalar_lea.hbm %s1045_s14, 128  ;;  %p1051_p11 = scmp.lt.s32.totalorder %s1045_s14, %s1460_s4 }
  0x36   : > { %v896_v23 = vld [vmem:[%s1238_s7 + $0x78] sm:$0xff]  ;;  %p1047_p1 = scmp.ne.s32.totalorder %s1045_s14, %s1046_s20  ;;  %s1050_s7 = scalar_lea.hbm %s1460_s4, 256 }
  0x37   : > { %p1052_p9 = scmp.lt.s32.totalorder %s1050_s7, %s1046_s20 }
  0x38   : > { %426 = vmatpush.bf16.msra.mxu0 %v897_v7  ;;  %903 = vmatpush.bf16.msra.mxu1 %v897_v7  ;;  %p1048_p4 = pnand %p1047_p1, %p1202_p3 }
  0x39   : > { %904 = vmatpush.bf16.msra.mxu2 %v897_v7  ;;  %905 = vmatpush.bf16.msra.mxu3 %v897_v7  ;;  %p1053_p2 = por %p1052_p9, %p1051_p11 }
  0x3a   : > { %p1049_p8 = pneg %p1048_p4 }
  0x3b   : > { %859 = vmatmul.msk.bf16.vlgmr.msra.gmra.mxu0 %vm363_vm2, %v881_v8  ;;  %863 = vmatmul.msk.bf16.vlgmr.msra.gmra.mxu1 %vm363_vm2, %v885_v9 }
  0x3c   : > { %867 = vmatmul.msk.bf16.vlgmr.msra.gmra.mxu2 %vm363_vm2, %v889_v10  ;;  %871 = vmatmul.msk.bf16.vlgmr.msra.gmra.mxu3 %vm363_vm2, %v893_v11  ;;  %p1054_p10 = pnand %p1053_p2, %p1049_p8 }
  0x4b   : > { %860 = vmatmul.msk.bf16.gmra.mxu0 %vm363_vm2, %v882_v12  ;;  %864 = vmatmul.msk.bf16.gmra.mxu1 %vm363_vm2, %v886_v13 }
  0x4c   : > { %868 = vmatmul.msk.bf16.gmra.mxu2 %vm363_vm2, %v890_v14  ;;  %872 = vmatmul.msk.bf16.gmra.mxu3 %vm363_vm2, %v894_v15 }
  0x5b   : > { %861 = vmatmul.msk.bf16.gmra.mxu0 %vm363_vm2, %v883_v16  ;;  %865 = vmatmul.msk.bf16.gmra.mxu1 %vm363_vm2, %v887_v17 }
  0x5c   : > { %869 = vmatmul.msk.bf16.gmra.mxu2 %vm363_vm2, %v891_v18  ;;  %873 = vmatmul.msk.bf16.gmra.mxu3 %vm363_vm2, %v895_v19 }
  0x6b   : > { %862 = vmatmul.msk.bf16.gmra.mxu0 %vm363_vm2, %v884_v20  ;;  %866 = vmatmul.msk.bf16.gmra.mxu1 %vm363_vm2, %v888_v21 }
  0x6c   : > { %870 = vmatmul.msk.bf16.gmra.mxu2 %vm363_vm2, %v892_v22  ;;  %874 = vmatmul.msk.bf16.gmra.mxu3 %vm363_vm2, %v896_v23 }
  0xb8   : > { %v428_v26 = vpop.f32.mrf.mxu0  ;;  %v448_v27 = vpop.f32.mrf.mxu1 }
  0xb9   : > { %v513_v28 = vmul.f32 %v1283_v24, %v428_v26  ;;  %v521_v29 = vmul.f32 %v1283_v24, %v448_v27 }
  0xbb   : > { %v548_v30 = vadd.f32 %v1288_v25, %v513_v28  ;;  %v556_v31 = vadd.f32 %v1288_v25, %v521_v29 }
  0xbd   : > { %v580_v32 = vmax.f32 %v548_v30, 0.0  ;;  %v588_v33 = vmax.f32 %v556_v31, 0.0 }
  0xbf   : > { %v612_v34 = vpack.c.bf16 %v580_v32, %v580_v32  ;;  %v620_v35 = vpack.c.bf16 %v588_v33, %v588_v33  ;;  %v468_v36 = vpop.f32.mrf.mxu2  ;;  %v488_v37 = vpop.f32.mrf.mxu3 }
  0xc0   : > { %v529_v38 = vmul.f32 %v1283_v24, %v468_v36  ;;  %v537_v39 = vmul.f32 %v1283_v24, %v488_v37  ;;  %v430_v40 = vpop.f32.mrf.mxu0  ;;  %v450_v41 = vpop.f32.mrf.mxu1 }
  0xc1   : > { %645 = vst.msk [vmem:[%s1298_s23] sm:$0xf] %vm644_vm3, %v612_v34  ;;  %v514_v42 = vmul.f32 %v1283_v24, %v430_v40  ;;  %v522_v43 = vmul.f32 %v1283_v24, %v450_v41 }
  0xc2   : > { %653 = vst.msk [vmem:[%s1298_s23 + $0x20] sm:$0xf] %vm644_vm3, %v620_v35  ;;  %v564_v44 = vadd.f32 %v1288_v25, %v529_v38  ;;  %v572_v45 = vadd.f32 %v1288_v25, %v537_v39 }
  0xc3   : > { %v549_v46 = vadd.f32 %v1288_v25, %v514_v42  ;;  %v557_v47 = vadd.f32 %v1288_v25, %v522_v43 }
  0xc4   : > { %v596_v48 = vmax.f32 %v564_v44, 0.0  ;;  %v604_v49 = vmax.f32 %v572_v45, 0.0 }
  0xc5   : > { %v581_v50 = vmax.f32 %v549_v46, 0.0  ;;  %v589_v51 = vmax.f32 %v557_v47, 0.0 }
  0xc6   : > { %v628_v52 = vpack.c.bf16 %v596_v48, %v596_v48  ;;  %v636_v53 = vpack.c.bf16 %v604_v49, %v604_v49 }
  0xc7   : > { %v613_v54 = vpack.c.bf16 %v581_v50, %v581_v50  ;;  %v621_v55 = vpack.c.bf16 %v589_v51, %v589_v51  ;;  %v470_v56 = vpop.f32.mrf.mxu2  ;;  %v490_v57 = vpop.f32.mrf.mxu3 }
  0xc8   : > { %661 = vst.msk [vmem:[%s1298_s23 + $0x40] sm:$0xf] %vm644_vm3, %v628_v52  ;;  %v530_v58 = vmul.f32 %v1283_v24, %v470_v56  ;;  %v538_v59 = vmul.f32 %v1283_v24, %v490_v57  ;;  %v433_v60 = vpop.f32.mrf.mxu0  ;;  %v453_v61 = vpop.f32.mrf.mxu1 }
  0xc9   : > { %669 = vst.msk [vmem:[%s1298_s23 + $0x60] sm:$0xf] %vm644_vm3, %v636_v53  ;;  %v515_v62 = vmul.f32 %v1283_v24, %v433_v60  ;;  %v523_v63 = vmul.f32 %v1283_v24, %v453_v61 }
  0xca   : > { %646 = vst.msk [vmem:[%s1298_s23 + $0x4] sm:$0xf] %vm644_vm3, %v613_v54  ;;  %v565_v0 = vadd.f32 %v1288_v25, %v530_v58  ;;  %v573_v1 = vadd.f32 %v1288_v25, %v538_v59 }
  0xcb   : > { %654 = vst.msk [vmem:[%s1298_s23 + $0x24] sm:$0xf] %vm644_vm3, %v621_v55  ;;  %v550_v2 = vadd.f32 %v1288_v25, %v515_v62  ;;  %v558_v3 = vadd.f32 %v1288_v25, %v523_v63 }
  0xcc   : > { %v597_v4 = vmax.f32 %v565_v0, 0.0  ;;  %v605_v5 = vmax.f32 %v573_v1, 0.0 }
  0xcd   : > { %v582_v6 = vmax.f32 %v550_v2, 0.0  ;;  %v590_v7 = vmax.f32 %v558_v3, 0.0 }
  0xce   : > { %v629_v8 = vpack.c.bf16 %v597_v4, %v597_v4  ;;  %v637_v9 = vpack.c.bf16 %v605_v5, %v605_v5 }
  0xcf   : > { %v614_v10 = vpack.c.bf16 %v582_v6, %v582_v6  ;;  %v622_v11 = vpack.c.bf16 %v590_v7, %v590_v7  ;;  %v473_v12 = vpop.f32.mrf.mxu2  ;;  %v493_v13 = vpop.f32.mrf.mxu3 }
  0xd0   : > { %662 = vst.msk [vmem:[%s1298_s23 + $0x44] sm:$0xf] %vm644_vm3, %v629_v8  ;;  %v531_v14 = vmul.f32 %v1283_v24, %v473_v12  ;;  %v539_v15 = vmul.f32 %v1283_v24, %v493_v13  ;;  %v435_v16 = vpop.f32.mrf.mxu0  ;;  %v455_v17 = vpop.f32.mrf.mxu1 }
  0xd1   : > { %670 = vst.msk [vmem:[%s1298_s23 + $0x64] sm:$0xf] %vm644_vm3, %v637_v9  ;;  %v516_v18 = vmul.f32 %v1283_v24, %v435_v16  ;;  %v524_v19 = vmul.f32 %v1283_v24, %v455_v17 }
  0xd2   : > { %647 = vst.msk [vmem:[%s1298_s23 + $0x8] sm:$0xf] %vm644_vm3, %v614_v10  ;;  %v566_v20 = vadd.f32 %v1288_v25, %v531_v14  ;;  %v574_v21 = vadd.f32 %v1288_v25, %v539_v15 }
  0xd3   : > { %655 = vst.msk [vmem:[%s1298_s23 + $0x28] sm:$0xf] %vm644_vm3, %v622_v11  ;;  %v551_v22 = vadd.f32 %v1288_v25, %v516_v18  ;;  %v559_v23 = vadd.f32 %v1288_v25, %v524_v19 }
  0xd4   : > { %v598_v26 = vmax.f32 %v566_v20, 0.0  ;;  %v606_v27 = vmax.f32 %v574_v21, 0.0 }
  0xd5   : > { %v583_v28 = vmax.f32 %v551_v22, 0.0  ;;  %v591_v29 = vmax.f32 %v559_v23, 0.0 }
  0xd6   : > { %v630_v30 = vpack.c.bf16 %v598_v26, %v598_v26  ;;  %v638_v31 = vpack.c.bf16 %v606_v27, %v606_v27 }
  0xd7   : > { %v615_v32 = vpack.c.bf16 %v583_v28, %v583_v28  ;;  %v623_v33 = vpack.c.bf16 %v591_v29, %v591_v29  ;;  %v475_v34 = vpop.f32.mrf.mxu2  ;;  %v495_v35 = vpop.f32.mrf.mxu3 }
  0xd8   : > { %663 = vst.msk [vmem:[%s1298_s23 + $0x48] sm:$0xf] %vm644_vm3, %v630_v30  ;;  %v532_v36 = vmul.f32 %v1283_v24, %v475_v34  ;;  %v540_v37 = vmul.f32 %v1283_v24, %v495_v35  ;;  %v438_v38 = vpop.f32.mrf.mxu0  ;;  %v458_v39 = vpop.f32.mrf.mxu1 }
  0xd9   : > { %671 = vst.msk [vmem:[%s1298_s23 + $0x68] sm:$0xf] %vm644_vm3, %v638_v31  ;;  %v517_v40 = vmul.f32 %v1283_v24, %v438_v38  ;;  %v525_v41 = vmul.f32 %v1283_v24, %v458_v39 }
  0xda   : > { %648 = vst.msk [vmem:[%s1298_s23 + $0xc] sm:$0xf] %vm644_vm3, %v615_v32  ;;  %v567_v42 = vadd.f32 %v1288_v25, %v532_v36  ;;  %v575_v43 = vadd.f32 %v1288_v25, %v540_v37 }
  0xdb   : > { %656 = vst.msk [vmem:[%s1298_s23 + $0x2c] sm:$0xf] %vm644_vm3, %v623_v33  ;;  %v552_v44 = vadd.f32 %v1288_v25, %v517_v40  ;;  %v560_v45 = vadd.f32 %v1288_v25, %v525_v41 }
  0xdc   : > { %v599_v46 = vmax.f32 %v567_v42, 0.0  ;;  %v607_v47 = vmax.f32 %v575_v43, 0.0 }
  0xdd   : > { %v584_v48 = vmax.f32 %v552_v44, 0.0  ;;  %v592_v49 = vmax.f32 %v560_v45, 0.0 }
  0xde   : > { %v631_v50 = vpack.c.bf16 %v599_v46, %v599_v46  ;;  %v639_v51 = vpack.c.bf16 %v607_v47, %v607_v47 }
  0xdf   : > { %v616_v52 = vpack.c.bf16 %v584_v48, %v584_v48  ;;  %v624_v53 = vpack.c.bf16 %v592_v49, %v592_v49  ;;  %v478_v54 = vpop.f32.mrf.mxu2  ;;  %v498_v55 = vpop.f32.mrf.mxu3 }
  0xe0   : > { %664 = vst.msk [vmem:[%s1298_s23 + $0x4c] sm:$0xf] %vm644_vm3, %v631_v50  ;;  %v533_v56 = vmul.f32 %v1283_v24, %v478_v54  ;;  %v541_v57 = vmul.f32 %v1283_v24, %v498_v55  ;;  %v440_v58 = vpop.f32.mrf.mxu0  ;;  %v460_v59 = vpop.f32.mrf.mxu1 }
  0xe1   : > { %672 = vst.msk [vmem:[%s1298_s23 + $0x6c] sm:$0xf] %vm644_vm3, %v639_v51  ;;  %v518_v60 = vmul.f32 %v1283_v24, %v440_v58  ;;  %v526_v61 = vmul.f32 %v1283_v24, %v460_v59 }
  0xe2   : > { %649 = vst.msk [vmem:[%s1298_s23 + $0x10] sm:$0xf] %vm644_vm3, %v616_v52  ;;  %v568_v62 = vadd.f32 %v1288_v25, %v533_v56  ;;  %v576_v63 = vadd.f32 %v1288_v25, %v541_v57 }
  0xe3   : > { %657 = vst.msk [vmem:[%s1298_s23 + $0x30] sm:$0xf] %vm644_vm3, %v624_v53  ;;  %v553_v0 = vadd.f32 %v1288_v25, %v518_v60  ;;  %v561_v1 = vadd.f32 %v1288_v25, %v526_v61 }
  0xe4   : > { %v600_v2 = vmax.f32 %v568_v62, 0.0  ;;  %v608_v3 = vmax.f32 %v576_v63, 0.0 }
  0xe5   : > { %v585_v4 = vmax.f32 %v553_v0, 0.0  ;;  %v593_v5 = vmax.f32 %v561_v1, 0.0 }
  0xe6   : > { %v632_v6 = vpack.c.bf16 %v600_v2, %v600_v2  ;;  %v640_v7 = vpack.c.bf16 %v608_v3, %v608_v3 }
  0xe7   : > { %v617_v8 = vpack.c.bf16 %v585_v4, %v585_v4  ;;  %v625_v9 = vpack.c.bf16 %v593_v5, %v593_v5  ;;  %v480_v10 = vpop.f32.mrf.mxu2  ;;  %v500_v11 = vpop.f32.mrf.mxu3 }
  0xe8   : > { %665 = vst.msk [vmem:[%s1298_s23 + $0x50] sm:$0xf] %vm644_vm3, %v632_v6  ;;  %v534_v12 = vmul.f32 %v1283_v24, %v480_v10  ;;  %v542_v13 = vmul.f32 %v1283_v24, %v500_v11  ;;  %v443_v14 = vpop.f32.mrf.mxu0  ;;  %v463_v15 = vpop.f32.mrf.mxu1 }
  0xe9   : > { %673 = vst.msk [vmem:[%s1298_s23 + $0x70] sm:$0xf] %vm644_vm3, %v640_v7  ;;  %v519_v16 = vmul.f32 %v1283_v24, %v443_v14  ;;  %v527_v17 = vmul.f32 %v1283_v24, %v463_v15 }
  0xea   : > { %650 = vst.msk [vmem:[%s1298_s23 + $0x14] sm:$0xf] %vm644_vm3, %v617_v8  ;;  %v569_v18 = vadd.f32 %v1288_v25, %v534_v12  ;;  %v577_v19 = vadd.f32 %v1288_v25, %v542_v13 }
  0xeb   : > { %658 = vst.msk [vmem:[%s1298_s23 + $0x34] sm:$0xf] %vm644_vm3, %v625_v9  ;;  %v554_v20 = vadd.f32 %v1288_v25, %v519_v16  ;;  %v562_v21 = vadd.f32 %v1288_v25, %v527_v17 }
  0xec   : > { %v601_v22 = vmax.f32 %v569_v18, 0.0  ;;  %v609_v23 = vmax.f32 %v577_v19, 0.0 }
  0xed   : > { %v586_v26 = vmax.f32 %v554_v20, 0.0  ;;  %v594_v27 = vmax.f32 %v562_v21, 0.0 }
  0xee   : > { %v633_v28 = vpack.c.bf16 %v601_v22, %v601_v22  ;;  %v641_v29 = vpack.c.bf16 %v609_v23, %v609_v23 }
  0xef   : > { %v618_v30 = vpack.c.bf16 %v586_v26, %v586_v26  ;;  %v626_v31 = vpack.c.bf16 %v594_v27, %v594_v27  ;;  %v483_v32 = vpop.f32.mrf.mxu2  ;;  %v503_v33 = vpop.f32.mrf.mxu3 }
  0xf0   : > { %666 = vst.msk [vmem:[%s1298_s23 + $0x54] sm:$0xf] %vm644_vm3, %v633_v28  ;;  %v535_v34 = vmul.f32 %v1283_v24, %v483_v32  ;;  %v543_v35 = vmul.f32 %v1283_v24, %v503_v33  ;;  %v445_v36 = vpop.f32.mrf.mxu0  ;;  %v465_v37 = vpop.f32.mrf.mxu1 }
  0xf1   : > { %674 = vst.msk [vmem:[%s1298_s23 + $0x74] sm:$0xf] %vm644_vm3, %v641_v29  ;;  %v520_v38 = vmul.f32 %v1283_v24, %v445_v36  ;;  %v528_v39 = vmul.f32 %v1283_v24, %v465_v37 }
  0xf2   : > { %651 = vst.msk [vmem:[%s1298_s23 + $0x18] sm:$0xf] %vm644_vm3, %v618_v30  ;;  %v570_v40 = vadd.f32 %v1288_v25, %v535_v34  ;;  %v578_v41 = vadd.f32 %v1288_v25, %v543_v35 }
  0xf3   : > { %659 = vst.msk [vmem:[%s1298_s23 + $0x38] sm:$0xf] %vm644_vm3, %v626_v31  ;;  %v555_v42 = vadd.f32 %v1288_v25, %v520_v38  ;;  %v563_v43 = vadd.f32 %v1288_v25, %v528_v39 }
  0xf4   : > { %v602_v44 = vmax.f32 %v570_v40, 0.0  ;;  %v610_v45 = vmax.f32 %v578_v41, 0.0 }
  0xf5   : > { %v587_v46 = vmax.f32 %v555_v42, 0.0  ;;  %v595_v47 = vmax.f32 %v563_v43, 0.0 }
  0xf6   : > { %v634_v48 = vpack.c.bf16 %v602_v44, %v602_v44  ;;  %v642_v49 = vpack.c.bf16 %v610_v45, %v610_v45 }
  0xf7   : > { %v619_v50 = vpack.c.bf16 %v587_v46, %v587_v46  ;;  %v627_v51 = vpack.c.bf16 %v595_v47, %v595_v47  ;;  %v485_v52 = vpop.f32.mrf.mxu2  ;;  %v505_v53 = vpop.f32.mrf.mxu3 }
  0xf8   : > { %667 = vst.msk [vmem:[%s1298_s23 + $0x58] sm:$0xf] %vm644_vm3, %v634_v48  ;;  %v536_v54 = vmul.f32 %v1283_v24, %v485_v52  ;;  %v544_v55 = vmul.f32 %v1283_v24, %v505_v53 }
  0xf9   : > { %675 = vst.msk [vmem:[%s1298_s23 + $0x78] sm:$0xf] %vm644_vm3, %v642_v49 }
  0xfa   : > { %652 = vst.msk [vmem:[%s1298_s23 + $0x1c] sm:$0xf] %vm644_vm3, %v619_v50  ;;  %v571_v56 = vadd.f32 %v1288_v25, %v536_v54  ;;  %v579_v57 = vadd.f32 %v1288_v25, %v544_v55 }
  0xfb   : > { %660 = vst.msk [vmem:[%s1298_s23 + $0x3c] sm:$0xf] %vm644_vm3, %v627_v51 }
  0xfc   : > { %v603_v24 = vmax.f32 %v571_v56, 0.0  ;;  %v611_v58 = vmax.f32 %v579_v57, 0.0 }
  0xfe   : > { %v635_v59 = vpack.c.bf16 %v603_v24, %v603_v24  ;;  %v643_v60 = vpack.c.bf16 %v611_v58, %v611_v58 }
 0x100   : > { %668 = vst.msk [vmem:[%s1298_s23 + $0x5c] sm:$0xf] %vm644_vm3, %v635_v59 }
 0x101   : > { %676 = vst.msk [vmem:[%s1298_s23 + $0x7c] sm:$0xf] %vm644_vm3, %v643_v60 }
 0x102   : > { %1057 = shalt.err (!%p1054_p10)
}
 0x103   : > { %s1106_s10 = smov 64   ;;  %s1107_s30 = smov 4  }
 0x104   : > { %912 = dma.vmem_to_hbm [thread:$0]  (%p1202_p3), %s691_s19, 2048, %s693_s13, %s678_s12, %s1106_s10, %s1106_s10, %s1107_s30  }
 0x105 PF: > { %s707_s5 = sand.u32 1, %s1088_s15   ;;  %p1466_p12 = scmp.ge.s32.totalorder %s1100_s18, 2 }
 0x106   : > { %s708_s23 = scalar_lea.sflag [#allocation4], %s707_s5 }
 0x107   : > { %p923_p13 = pnand %p1466_p12, %p1168_p6 }
 0x109   : > { %p924_p0 = pneg %p923_p13 }
 0x10b   : > { %1083 = dma.done.wait (%p924_p0), %s708_s23, 2048  }
 0x10c   : > { %1085 = vsyncadd (%p924_p0), %s708_s23, 4294965248  ;;  %p18_p5 = scmp.ge.s32.totalorder %s1186_s29, 4   ;;  %s1467_s15 = smov %s1092_s16 }
 0x10d   : > { %s1468_s16 = smov %s1096_s17  ;;  %s1469_s17 = smov %s1198_s8 }
 0x10e   : > { %s1470_s18 = smov %s1186_s29  ;;  %20 = sbr.rel (!%p18_p5) target bundleno = 6 (0x6), region = 85 }
 0x113   :  { %714 = vsyncpa [#allocation3], 1 }
 0x114   :  { %716 = vsyncpa [#allocation3 + $0x1], 1 }
 0x115   :  { %717 = vsyncpa [#allocation6], 1 }
 0x116   :  { %718 = vsyncpa [#allocation4], 1 }
 0x117   :  { %720 = vsyncpa [#allocation4 + $0x1], 1 }

</bundles_post_ra>
